<compile_context>
chip_gen: v6e
topology: v6e:2x2x1
jax: 0.10.0
libtpu: 0.0.40
codegen_flags: <defaults>
</compile_context>

<pallas_src>
import functools

import jax
import jax.numpy as jnp
from jax.experimental import pallas as pl
from jax.experimental.pallas import tpu as pltpu


def _round_up(a, b):
    return (a + b - 1) // b * b


def _chip_traits():
    """Returns (GELU compute dtype, whether the chip has 2 TensorCores)."""
    try:
        kind = jax.devices()[0].device_kind.lower()
    except Exception:
        return jnp.bfloat16, False
    # v5e and older have no bf16 VALU/EUP -> keep the GELU polynomial in f32.
    old = any(t in kind for t in ("v2", "v3", "v4", "v5"))
    dual = "7" in kind  # v7x: 2 TensorCores per chip
    return (jnp.float32 if old else jnp.bfloat16), dual


def _vmem_cap_bytes():
    # Per-generation VMEM ceiling with headroom for Mosaic internal scratch:
    # ~108 MiB on v5e/v6e (128 MiB physical), ~54 MiB on v7x (64 MiB physical).
    try:
        return int(pltpu.get_tpu_info().vmem_capacity_bytes * 0.85)
    except Exception:
        return 54 << 20


def _mlp_kernel(x_ref, w1_ref, b1_ref, w2_ref, b2_ref, o_ref, acc_ref, *,
                gelu_dtype):
    j = pl.program_id(1)

    @pl.when(j == 0)
    def _():
        acc_ref[...] = jnp.zeros_like(acc_ref)

    # First linear slice: (bm, D) @ (D, bh) -> (bm, bh). bf16 operands, f32 MXU acc.
    h = jnp.dot(x_ref[...], w1_ref[...], preferred_element_type=jnp.float32)
    h = h + b1_ref[...]                      # f32 bias, (1, bh) broadcasts over rows

    # new_gelu (tanh approximation). bf16 on chips with bf16 VALU/EUP, else f32.
    c = 0.7978845608028654                   # sqrt(2/pi)
    hg = h.astype(gelu_dtype)
    h2 = hg * hg                             # reuse h*h for the cubic term
    hg = 0.5 * hg * (1.0 + jnp.tanh(c * hg * (1.0 + 0.044715 * h2)))

    # Second linear slice accumulated into the f32 scratch: (bm, bh) @ (bh, D).
    acc_ref[...] += jnp.dot(hg.astype(jnp.bfloat16), w2_ref[...],
                            preferred_element_type=jnp.float32)

    @pl.when(j == pl.num_programs(1) - 1)
    def _():
        # TODO(synk): dropout with p=0.0 is an identity; for p>0 use pltpu.prng_* here.
        o_ref[...] = (acc_ref[...] + b2_ref[...]).astype(o_ref.dtype)


def mlp_pallas(x, w_fc, b_fc, w_proj, b_proj, *, block_m=512, block_h=512):
    """x: (B, T, D). Weights in (in, out) layout, any float dtype."""
    B, T, D = x.shape
    H = w_fc.shape[1]
    M = B * T

    gelu_dtype, dual_core = _chip_traits()

    # ----- M tiling (token rows) -----
    m_align = 128 if M >= 128 else 8
    block_m = max(m_align, min(block_m, _round_up(M, m_align)))
    block_m = _round_up(block_m, m_align)
    if dual_core and M > m_align and _round_up(M, block_m) // block_m < 2:
        # Keep >= 2 M steps so both v7x TensorCores get work.
        block_m = max(m_align, _round_up((M + 1) // 2, m_align))
    M_pad = _round_up(M, block_m)

    # ----- H tiling (hidden features, streamed weight slices) -----
    block_h = max(256, min(block_h, _round_up(H, 256)))
    block_h = _round_up(block_h, 256)
    H_pad = _round_up(H, block_h)

    # bf16 activations + weights for full MXU rate & half the DMA bytes; f32 biases.
    x2d = x.reshape(M, D).astype(jnp.bfloat16)
    if M_pad != M:
        x2d = jnp.pad(x2d, ((0, M_pad - M), (0, 0)))
    w1 = w_fc.astype(jnp.bfloat16)
    w2 = w_proj.astype(jnp.bfloat16)
    b1 = b_fc.reshape(1, H).astype(jnp.float32)
    b2 = b_proj.reshape(1, D).astype(jnp.float32)
    if H_pad != H:
        # Zero-padding H is exact: padded W_proj rows are zero, so they add nothing.
        w1 = jnp.pad(w1, ((0, 0), (0, H_pad - H)))
        b1 = jnp.pad(b1, ((0, 0), (0, H_pad - H)))
        w2 = jnp.pad(w2, ((0, H_pad - H), (0, 0)))

    # ----- explicit VMEM budget, capped per-generation with headroom -----
    out_bytes = jnp.dtype(x.dtype).itemsize
    need = (2 * block_m * D * 2              # x tile (bf16), double-buffered
            + 2 * D * block_h * 2            # W_fc slice (bf16)
            + 2 * block_h * 4                # b_fc slice
            + 2 * block_h * D * 2            # W_proj slice (bf16)
            + 2 * D * 4                      # b_proj
            + 2 * block_m * D * out_bytes    # output tile
            + block_m * D * 4                # f32 accumulator scratch
            + 2 * block_m * block_h * 4      # live hidden slice (+ cast headroom)
            + (8 << 20))                     # Mosaic internal scratch / spill headroom
    vmem_limit = int(min(max(need, 32 << 20), _vmem_cap_bytes()))

    # ----- cost estimate: two matmuls + one tanh per hidden element -----
    cost = pl.CostEstimate(
        flops=2 * 2 * M_pad * D * H_pad,
        transcendentals=M_pad * H_pad,
        bytes_accessed=int(x2d.size * 2 + w1.size * 2 + w2.size * 2
                           + b1.size * 4 + b2.size * 4 + M_pad * D * out_bytes),
    )

    kernel = functools.partial(_mlp_kernel, gelu_dtype=gelu_dtype)
    out2d = pl.pallas_call(
        kernel,
        out_shape=jax.ShapeDtypeStruct((M_pad, D), x.dtype),
        grid_spec=pltpu.PrefetchScalarGridSpec(
            num_scalar_prefetch=0,
            grid=(M_pad // block_m, H_pad // block_h),
            in_specs=[
                pl.BlockSpec((block_m, D), lambda i, j: (i, 0)),   # x tile (constant in j)
                pl.BlockSpec((D, block_h), lambda i, j: (0, j)),   # W_fc slice
                pl.BlockSpec((1, block_h), lambda i, j: (0, j)),   # b_fc slice
                pl.BlockSpec((block_h, D), lambda i, j: (j, 0)),   # W_proj slice
                pl.BlockSpec((1, D), lambda i, j: (0, 0)),         # b_proj
            ],
            out_specs=pl.BlockSpec((block_m, D), lambda i, j: (i, 0)),
            scratch_shapes=[pltpu.VMEM((block_m, D), jnp.float32)],
        ),
        compiler_params=pltpu.CompilerParams(
            dimension_semantics=("parallel", "arbitrary"),
            vmem_limit_bytes=vmem_limit,
        ),
        cost_estimate=cost,
    )(x2d, w1, b1, w2, b2)

    if M_pad != M:
        out2d = out2d[:M]
    return out2d.reshape(B, T, D)


# ---------------------------------------------------------------------------
# references
# ---------------------------------------------------------------------------
def _new_gelu(h):
    c = 0.7978845608028654
    return 0.5 * h * (1.0 + jnp.tanh(c * (h + 0.044715 * h ** 3)))


def mlp_reference_f32(x, w_fc, b_fc, w_proj, b_proj):
    h = _new_gelu(x @ w_fc + b_fc)
    return h @ w_proj + b_proj


def mlp_reference_mixed(x, w_fc, b_fc, w_proj, b_proj, gelu_dtype):
    # Mirrors the kernel's precision: bf16 matmul operands, f32 accumulation,
    # GELU polynomial in gelu_dtype.
    h = jnp.dot(x.astype(jnp.bfloat16), w_fc.astype(jnp.bfloat16),
                preferred_element_type=jnp.float32) + b_fc
    c = 0.7978845608028654
    hg = h.astype(gelu_dtype)
    h2 = hg * hg
    hg = 0.5 * hg * (1.0 + jnp.tanh(c * hg * (1.0 + 0.044715 * h2)))
    return jnp.dot(hg.astype(jnp.bfloat16), w_proj.astype(jnp.bfloat16),
                   preferred_element_type=jnp.float32) + b_proj


if __name__ == "__main__":
    # Small shapes consistent with the module (n_embd scaled down), hidden = 4*n_embd.
    B, T, D = 2, 8, 128
    H = 4 * D

    key = jax.random.PRNGKey(0)
    kx, k1, k2, k3, k4 = jax.random.split(key, 5)

    x = jax.random.normal(kx, (B, T, D), dtype=jnp.float32)
    w_fc = jax.random.normal(k1, (D, H), dtype=jnp.float32) * 0.02
    b_fc = jax.random.normal(k2, (H,), dtype=jnp.float32) * 0.02
    w_proj = jax.random.normal(k3, (H, D), dtype=jnp.float32) * 0.02
    b_proj = jax.random.normal(k4, (D,), dtype=jnp.float32) * 0.02

    out = mlp_pallas(x, w_fc, b_fc, w_proj, b_proj)
    out = jax.block_until_ready(out)

    gelu_dtype, _ = _chip_traits()
    ref_mixed = mlp_reference_mixed(x, w_fc, b_fc, w_proj, b_proj, gelu_dtype)
    ref_f32 = mlp_reference_f32(x, w_fc, b_fc, w_proj, b_proj)

    assert out.shape == (B, T, D)
    # Tight match vs. a reference at the same (bf16 operand / f32 accum) precision.
    assert jnp.allclose(out, ref_mixed, atol=5e-3, rtol=5e-3), "mismatch vs mixed-precision reference"
    # Loose match vs. the pure-f32 PyTorch-equivalent reference (bf16 quantization error).
    assert jnp.allclose(out, ref_f32, atol=3e-2, rtol=3e-2), "mismatch vs f32 reference"

    print("KERNEL_OK")
</pallas_src>

<mosaic_0001>
module attributes {stable_mosaic.version = 11 : i64} {
  func.func @_mlp_kernel(%arg0: i32, %arg1: i32, %arg2: memref<16x128xbf16, #tpu.memory_space<vmem>>, %arg3: memref<128x512xbf16, #tpu.memory_space<vmem>>, %arg4: memref<1x512xf32, #tpu.memory_space<vmem>>, %arg5: memref<512x128xbf16, #tpu.memory_space<vmem>>, %arg6: memref<1x128xf32, #tpu.memory_space<vmem>>, %arg7: memref<16x128xf32, #tpu.memory_space<vmem>>, %arg8: memref<16x128xf32, #tpu.memory_space<vmem>>) attributes {dimension_semantics = [#tpu.dimension_semantics<parallel>, #tpu.dimension_semantics<arbitrary>], iteration_bounds = array<i64: 1, 1>, scalar_prefetch = 0 : i64, scratch_operands = 1 : i64, tpu.core_type = #tpu.core_type<tc>, window_params = [{transform_indices = @transform_0, window_bounds = array<i64: 16, 128>}, {transform_indices = @transform_1, window_bounds = array<i64: 128, 512>}, {transform_indices = @transform_2, window_bounds = array<i64: 1, 512>}, {transform_indices = @transform_3, window_bounds = array<i64: 512, 128>}, {pipeline_mode = #tpu.pipeline_mode<synchronous>, transform_indices = @transform_4, window_bounds = array<i64: 1, 128>}, {transform_indices = @transform_5, window_bounds = array<i64: 16, 128>}]} {
    %c0_i32 = arith.constant 0 : i32
    %0 = arith.cmpi eq, %arg1, %c0_i32 : i32
    %1 = arith.extui %0 : i1 to i32
    %c0_i32_0 = arith.constant 0 : i32
    %2 = arith.cmpi ne, %1, %c0_i32_0 : i32
    scf.if %2 {
      %cst_20 = arith.constant 0.000000e+00 : f32
      %32 = vector.broadcast %cst_20 : f32 to vector<16x128xf32>
      %c0_21 = arith.constant 0 : index
      %c0_22 = arith.constant 0 : index
      %33 = vector.load %arg8[%c0_21, %c0_22] : memref<16x128xf32, #tpu.memory_space<vmem>>, vector<16x128xf32>
      tpu.vector_store %arg8[%c0_21, %c0_22], %32 {strides = array<i32>} : memref<16x128xf32, #tpu.memory_space<vmem>>, vector<16x128xf32>,
    } else {
    }
    %c0 = arith.constant 0 : index
    %c0_1 = arith.constant 0 : index
    %3 = vector.load %arg2[%c0, %c0_1] : memref<16x128xbf16, #tpu.memory_space<vmem>>, vector<16x128xbf16>
    %c0_2 = arith.constant 0 : index
    %c0_3 = arith.constant 0 : index
    %4 = vector.load %arg3[%c0_2, %c0_3] : memref<128x512xbf16, #tpu.memory_space<vmem>>, vector<128x512xbf16>
    %cst = arith.constant dense<0.000000e+00> : vector<16x512xf32>
    %5 = tpu.matmul %3, %4, %cst {dimension_numbers = #tpu.dot_dimension_numbers<[1], [0], [0], [1], [0, 0, 1, 1], [], []>} : vector<16x128xbf16>, vector<128x512xbf16>, vector<16x512xf32> -> vector<16x512xf32>
    %c0_4 = arith.constant 0 : index
    %c0_5 = arith.constant 0 : index
    %6 = vector.load %arg4[%c0_4, %c0_5] : memref<1x512xf32, #tpu.memory_space<vmem>>, vector<1x512xf32>
    %7 = vector.broadcast %6 : vector<1x512xf32> to vector<16x512xf32>
    %8 = arith.addf %5, %7 : vector<16x512xf32>
    %9 = arith.truncf %8 : vector<16x512xf32> to vector<16x512xbf16>
    %10 = arith.mulf %9, %9 : vector<16x512xbf16>
    %cst_6 = arith.constant 5.000000e-01 : bf16
    %11 = vector.broadcast %cst_6 : bf16 to vector<16x512xbf16>
    %12 = arith.mulf %11, %9 : vector<16x512xbf16>
    %cst_7 = arith.constant 7.968750e-01 : bf16
    %13 = vector.broadcast %cst_7 : bf16 to vector<16x512xbf16>
    %14 = arith.mulf %13, %9 : vector<16x512xbf16>
    %cst_8 = arith.constant 4.467770e-02 : bf16
    %15 = vector.broadcast %cst_8 : bf16 to vector<16x512xbf16>
    %16 = arith.mulf %15, %10 : vector<16x512xbf16>
    %cst_9 = arith.constant 1.000000e+00 : bf16
    %17 = vector.broadcast %cst_9 : bf16 to vector<16x512xbf16>
    %18 = arith.addf %17, %16 : vector<16x512xbf16>
    %19 = arith.mulf %14, %18 : vector<16x512xbf16>
    %20 = math.tanh %19 : vector<16x512xbf16>
    %cst_10 = arith.constant 1.000000e+00 : bf16
    %21 = vector.broadcast %cst_10 : bf16 to vector<16x512xbf16>
    %22 = arith.addf %21, %20 : vector<16x512xbf16>
    %23 = arith.mulf %12, %22 : vector<16x512xbf16>
    %c0_11 = arith.constant 0 : index
    %c0_12 = arith.constant 0 : index
    %24 = vector.load %arg8[%c0_11, %c0_12] : memref<16x128xf32, #tpu.memory_space<vmem>>, vector<16x128xf32>
    %c0_13 = arith.constant 0 : index
    %c0_14 = arith.constant 0 : index
    %25 = vector.load %arg5[%c0_13, %c0_14] : memref<512x128xbf16, #tpu.memory_space<vmem>>, vector<512x128xbf16>
    %cst_15 = arith.constant dense<0.000000e+00> : vector<16x128xf32>
    %26 = tpu.matmul %23, %25, %cst_15 {dimension_numbers = #tpu.dot_dimension_numbers<[1], [0], [0], [1], [0, 0, 1, 1], [], []>} : vector<16x512xbf16>, vector<512x128xbf16>, vector<16x128xf32> -> vector<16x128xf32>
    %27 = arith.addf %24, %26 : vector<16x128xf32>
    %c0_16 = arith.constant 0 : index
    %c0_17 = arith.constant 0 : index
    %28 = vector.load %arg8[%c0_16, %c0_17] : memref<16x128xf32, #tpu.memory_space<vmem>>, vector<16x128xf32>
    tpu.vector_store %arg8[%c0_16, %c0_17], %27 {strides = array<i32>} : memref<16x128xf32, #tpu.memory_space<vmem>>, vector<16x128xf32>,
    %c0_i32_18 = arith.constant 0 : i32
    %29 = arith.cmpi eq, %arg1, %c0_i32_18 : i32
    %30 = arith.extui %29 : i1 to i32
    %c0_i32_19 = arith.constant 0 : i32
    %31 = arith.cmpi ne, %30, %c0_i32_19 : i32
    scf.if %31 {
      %c0_20 = arith.constant 0 : index
      %c0_21 = arith.constant 0 : index
      %32 = vector.load %arg8[%c0_20, %c0_21] : memref<16x128xf32, #tpu.memory_space<vmem>>, vector<16x128xf32>
      %c0_22 = arith.constant 0 : index
      %c0_23 = arith.constant 0 : index
      %33 = vector.load %arg6[%c0_22, %c0_23] : memref<1x128xf32, #tpu.memory_space<vmem>>, vector<1x128xf32>
      %34 = vector.broadcast %33 : vector<1x128xf32> to vector<16x128xf32>
      %35 = arith.addf %32, %34 : vector<16x128xf32>
      %c0_24 = arith.constant 0 : index
      %c0_25 = arith.constant 0 : index
      %36 = vector.load %arg7[%c0_24, %c0_25] : memref<16x128xf32, #tpu.memory_space<vmem>>, vector<16x128xf32>
      tpu.vector_store %arg7[%c0_24, %c0_25], %35 {strides = array<i32>} : memref<16x128xf32, #tpu.memory_space<vmem>>, vector<16x128xf32>,
    } else {
    }
    return
  }
  func.func @transform_0(%arg0: i32, %arg1: i32) -> (i32, i32) {
    %c0_i32 = arith.constant 0 : i32
    %c0_i32_0 = arith.constant 0 : i32
    return %arg0, %c0_i32 : i32, i32
  }
  func.func @transform_1(%arg0: i32, %arg1: i32) -> (i32, i32) {
    %c0_i32 = arith.constant 0 : i32
    %c0_i32_0 = arith.constant 0 : i32
    return %c0_i32, %arg1 : i32, i32
  }
  func.func @transform_2(%arg0: i32, %arg1: i32) -> (i32, i32) {
    %c0_i32 = arith.constant 0 : i32
    %c0_i32_0 = arith.constant 0 : i32
    return %c0_i32, %arg1 : i32, i32
  }
  func.func @transform_3(%arg0: i32, %arg1: i32) -> (i32, i32) {
    %c0_i32 = arith.constant 0 : i32
    %c0_i32_0 = arith.constant 0 : i32
    return %arg1, %c0_i32 : i32, i32
  }
  func.func @transform_4(%arg0: i32, %arg1: i32) -> (i32, i32) {
    %c0_i32 = arith.constant 0 : i32
    %c0_i32_0 = arith.constant 0 : i32
    %c0_i32_1 = arith.constant 0 : i32
    return %c0_i32, %c0_i32_0 : i32, i32
  }
  func.func @transform_5(%arg0: i32, %arg1: i32) -> (i32, i32) {
    %c0_i32 = arith.constant 0 : i32
    %c0_i32_0 = arith.constant 0 : i32
    return %arg0, %c0_i32 : i32, i32
  }
}

</mosaic_0001>

<bundles_post_ra>
// kernel: tpu_custom_call.1
= control target key start
LH: loop header
LB: loop body
LE: loop exit
PB: predicated region body
PF: predicated region fallthrough
CT: control target
= control target key end

     0   :  { %10 = vsyncpa [#allocation4], 0  ;;  %s1191_s0 = inlined_call_operand.hbm [shape: bf16[16,128], index: 0, kind: input, shape index: {}]   ;;  %s1192_s1 = inlined_call_operand.hbm [shape: bf16[128,512], index: 1, kind: input, shape index: {}]   ;;  %s1193_s2 = inlined_call_operand.hbm [shape: f32[1,512], index: 2, kind: input, shape index: {}]   ;;  %s1194_s3 = inlined_call_operand.hbm [shape: bf16[512,128], index: 3, kind: input, shape index: {}]   ;;  %s1195_s4 = inlined_call_operand.vmem [shape: f32[1,128], index: 4, kind: input, shape index: {}]   ;;  %s1196_s5 = inlined_call_operand.hbm [shape: f32[16,128], index: 5, kind: output, shape index: {}]  }
   0x1   :  { %11 = vsyncpa [#allocation7], 0 }
   0x2   :  { %12 = vsyncpa [#allocation10], 0 }
   0x3   :  { %13 = vsyncpa [#allocation5], 0  ;;  %s1131_s18 = smov [#allocation6]  }
   0x4   :  { %s31_s19 = sshll.u32 %s1131_s18, 4  ;;  %s32_s19 = int_to_ptr.vmem [resolvable:$true] %s31_s19 }
   0x5   :  { %s1031_s20 = scalar_lea.vmem %s32_s19, 4096  ;;  %p1036_p1 = scmp.lt.s32.totalorder %s32_s19, %s32_s19 }
   0x6   :  { %p1032_p0 = scmp.ne.s32.totalorder %s32_s19, %s1031_s20  ;;  %p1037_p2 = scmp.lt.s32.totalorder %s1031_s20, %s1031_s20 }
   0x8   :  { %p1038_p3 = por %p1037_p2, %p1036_p1 }
   0xa   :  { %p1039_p4 = pnand %p1038_p3, %p1032_p0 }
   0xc   :  { %1042 = shalt.err (!%p1039_p4)
}
   0xd   :  { %s1132_s21 = smov 256   ;;  %s1133_s22 = smov 16  }
   0xe   :  { %37 = dma.hbm_to_vmem [thread:$0]  %s1192_s1, 4096, %s32_s19, [#allocation7], %s1132_s21, %s1132_s21, %s1133_s22  }
   0xf   :  { %s1134_s25 = smov [#allocation3]  }
  0x10   :  { %s19_s26 = sshll.u32 %s1134_s25, 4  ;;  %s20_s26 = int_to_ptr.vmem [resolvable:$true] %s19_s26 }
  0x11   :  { %s1051_s27 = scalar_lea.vmem %s20_s26, 128  ;;  %p1056_p6 = scmp.lt.s32.totalorder %s20_s26, %s20_s26 }
  0x12   :  { %p1052_p5 = scmp.ne.s32.totalorder %s20_s26, %s1051_s27  ;;  %p1057_p7 = scmp.lt.s32.totalorder %s1051_s27, %s1051_s27 }
  0x14   :  { %p1058_p8 = por %p1057_p7, %p1056_p6 }
  0x16   :  { %p1059_p9 = pnand %p1058_p8, %p1052_p5 }
  0x18   :  { %1062 = shalt.err (!%p1059_p9)
}
  0x19   :  { %s1135_s28 = smov 64   ;;  %s1136_s29 = smov 4  }
  0x1a   :  { %25 = dma.hbm_to_vmem [thread:$0]  %s1191_s0, 128, %s20_s26, [#allocation4], %s1135_s28, %s1135_s28, %s1136_s29  }
  0x1b   :  { %s1137_s7 = smov [#allocation8]   ;;  %s1138_s9 = smov [#allocation9]  }
  0x1c   :  { %s44_s8 = sshll.u32 %s1137_s7, 4  ;;  %s53_s1 = sshll.u32 %s1138_s9, 4  ;;  %s45_s8 = int_to_ptr.vmem [resolvable:$true] %s44_s8  ;;  %s54_s1 = int_to_ptr.vmem [resolvable:$true] %s53_s1 }
  0x1d   :  { %s1071_s10 = scalar_lea.vmem %s45_s8, 64  ;;  %p1076_p11 = scmp.lt.s32.totalorder %s45_s8, %s45_s8 }
  0x1e   :  { %p1072_p10 = scmp.ne.s32.totalorder %s45_s8, %s1071_s10  ;;  %p1077_p12 = scmp.lt.s32.totalorder %s1071_s10, %s1071_s10 }
  0x20   :  { %p1078_p13 = por %p1077_p12, %p1076_p11 }
  0x22   :  { %p1079_p0 = pnand %p1078_p13, %p1072_p10 }
  0x24   :  { %1082 = shalt.err (!%p1079_p0)
}
  0x25   :  { %47 = dma.hbm_to_vmem [thread:$0]  %s1193_s2, 64, %s45_s8, [#allocation7]  }
  0x26   :  { %s1091_s13 = scalar_lea.vmem %s54_s1, 4096  ;;  %p1096_p2 = scmp.lt.s32.totalorder %s54_s1, %s54_s1 }
  0x27   :  { %p1092_p1 = scmp.ne.s32.totalorder %s54_s1, %s1091_s13  ;;  %p1097_p3 = scmp.lt.s32.totalorder %s1091_s13, %s1091_s13 }
  0x29   :  { %p1098_p4 = por %p1097_p3, %p1096_p2 }
  0x2b   :  { %p1099_p5 = pnand %p1098_p4, %p1092_p1 }
  0x2d   :  { %1102 = shalt.err (!%p1099_p5)
}
  0x2e   :  { %59 = dma.hbm_to_vmem [thread:$0]  %s1194_s3, 4096, %s54_s1, [#allocation10], %s1135_s28, %s1135_s28, %s1136_s29  }
  0x2f   :  { %1123 = dma.done.wait [#allocation4], 128  }
  0x30   :  { %1124 = vsyncadd [#allocation4], 4294967168 }
  0x31   :  { %1125 = dma.done.wait [#allocation7], 4160  }
  0x32   :  { %1126 = vsyncadd [#allocation7], 4294963136 }
  0x33   :  { %1127 = dma.done.wait [#allocation10], 4096  }
  0x34   :  { %1128 = vsyncadd [#allocation10], 4294963200  ;;  %v1139_v0 = vmov 0   ;;  %v934_v1 = vld [vmem:[#allocation6 + $0xe4] ss:$16 sps:$4 sm:$0xff]   ;;  %v982_v33 = vld [vmem:[#allocation3] sm:$0xff]  }
  0x35   :  { %339 = vmatprep.mubr.bf16.mxu0 %v1139_v0  ;;  %382 = vmatprep.mubr.bf16.mxu1 %v1139_v0  ;;  %v936_v2 = vld [vmem:[#allocation6 + $0xec] ss:$16 sps:$4 sm:$0xff]   ;;  %v938_v3 = vld [vmem:[#allocation6 + $0xe0] ss:$16 sps:$4 sm:$0xff]   ;;  %v939_v4 = vld [vmem:[#allocation6 + $0xe8] ss:$16 sps:$4 sm:$0xff]  }
  0x36   :  { %307 = vmatprep.subr.bf16.mxu0 %v934_v1  ;;  %350 = vmatprep.subr.bf16.mxu1 %v936_v2  ;;  %v940_v5 = vld [vmem:[#allocation6 + $0xc4] ss:$16 sps:$4 sm:$0xff]   ;;  %v942_v6 = vld [vmem:[#allocation6 + $0xcc] ss:$16 sps:$4 sm:$0xff]   ;;  %v944_v7 = vld [vmem:[#allocation6 + $0xc0] ss:$16 sps:$4 sm:$0xff]   ;;  %v121_v2 = vlaneseq }
  0x37   :  { %308 = vmatpush1.bf16.msra.mxu0 %v938_v3  ;;  %351 = vmatpush1.bf16.msra.mxu1 %v939_v4  ;;  %v945_v8 = vld [vmem:[#allocation6 + $0xc8] ss:$16 sps:$4 sm:$0xff]   ;;  %v946_v9 = vld [vmem:[#allocation6 + $0xa4] ss:$16 sps:$4 sm:$0xff]   ;;  %v948_v10 = vld [vmem:[#allocation6 + $0xac] ss:$16 sps:$4 sm:$0xff]  }
  0x38   :  { %309 = vmatprep.subr.bf16.mxu0 %v940_v5  ;;  %352 = vmatprep.subr.bf16.mxu1 %v942_v6  ;;  %v950_v11 = vld [vmem:[#allocation6 + $0xa0] ss:$16 sps:$4 sm:$0xff]   ;;  %v951_v12 = vld [vmem:[#allocation6 + $0xa8] ss:$16 sps:$4 sm:$0xff]   ;;  %v952_v13 = vld [vmem:[#allocation6 + $0x84] ss:$16 sps:$4 sm:$0xff]  }
  0x39   :  { %v954_v14 = vld [vmem:[#allocation6 + $0x8c] ss:$16 sps:$4 sm:$0xff]   ;;  %v956_v15 = vld [vmem:[#allocation6 + $0x80] ss:$16 sps:$4 sm:$0xff]   ;;  %v957_v16 = vld [vmem:[#allocation6 + $0x88] ss:$16 sps:$4 sm:$0xff]  }
  0x3a   :  { %v958_v17 = vld [vmem:[#allocation6 + $0x64] ss:$16 sps:$4 sm:$0xff]   ;;  %v960_v18 = vld [vmem:[#allocation6 + $0x6c] ss:$16 sps:$4 sm:$0xff]   ;;  %v962_v19 = vld [vmem:[#allocation6 + $0x60] ss:$16 sps:$4 sm:$0xff]  }
  0x3b   :  { %310 = vmatpush1.bf16.msra.mxu0 %v944_v7  ;;  %353 = vmatpush1.bf16.msra.mxu1 %v945_v8  ;;  %v963_v20 = vld [vmem:[#allocation6 + $0x68] ss:$16 sps:$4 sm:$0xff]   ;;  %v964_v21 = vld [vmem:[#allocation6 + $0x44] ss:$16 sps:$4 sm:$0xff]   ;;  %v966_v22 = vld [vmem:[#allocation6 + $0x4c] ss:$16 sps:$4 sm:$0xff]  }
  0x3c   :  { %311 = vmatprep.subr.bf16.mxu0 %v946_v9  ;;  %354 = vmatprep.subr.bf16.mxu1 %v948_v10  ;;  %v968_v23 = vld [vmem:[#allocation6 + $0x40] ss:$16 sps:$4 sm:$0xff]   ;;  %v969_v24 = vld [vmem:[#allocation6 + $0x48] ss:$16 sps:$4 sm:$0xff]   ;;  %v970_v25 = vld [vmem:[#allocation6 + $0x24] ss:$16 sps:$4 sm:$0xff]  }
  0x3d   :  { %v972_v26 = vld [vmem:[#allocation6 + $0x2c] ss:$16 sps:$4 sm:$0xff]   ;;  %v974_v27 = vld [vmem:[#allocation6 + $0x20] ss:$16 sps:$4 sm:$0xff]   ;;  %v975_v28 = vld [vmem:[#allocation6 + $0x28] ss:$16 sps:$4 sm:$0xff]  }
  0x3e   :  { %v976_v29 = vld [vmem:[#allocation6 + $0x4] ss:$16 sps:$4 sm:$0xff]   ;;  %v978_v30 = vld [vmem:[#allocation6 + $0xc] ss:$16 sps:$4 sm:$0xff]   ;;  %v980_v31 = vld [vmem:[#allocation6] ss:$16 sps:$4 sm:$0xff]  }
  0x3f   :  { %312 = vmatpush1.bf16.msra.mxu0 %v950_v11  ;;  %355 = vmatpush1.bf16.msra.mxu1 %v951_v12  ;;  %v981_v32 = vld [vmem:[#allocation6 + $0x8] ss:$16 sps:$4 sm:$0xff]   ;;  %v983_v34 = vld [vmem:[#allocation9 + $0x78] sm:$0xff]   ;;  %v991_v42 = vld [vmem:[#allocation9 + $0x68] sm:$0xff]   ;;  %v122_v3 = vshrl.u32 %v121_v2, 7  ;;  %s1140_s15 = smov [#allocation11]  }
  0x40   :  { %313 = vmatprep.subr.bf16.mxu0 %v952_v13  ;;  %356 = vmatprep.subr.bf16.mxu1 %v954_v14  ;;  %v984_v35 = vld [vmem:[#allocation9 + $0xf8] sm:$0xff]   ;;  %v987_v38 = vld [vmem:[#allocation9 + $0x70] sm:$0xff]   ;;  %v992_v43 = vld [vmem:[#allocation9 + $0xe8] sm:$0xff]   ;;  %s798_s16 = sshll.u32 %s1140_s15, 4  ;;  %s799_s16 = int_to_ptr.vmem [resolvable:$true] %s798_s16 }
  0x41   :  { %v985_v36 = vld [vmem:[#allocation9 + $0x38] sm:$0xff]   ;;  %v988_v39 = vld [vmem:[#allocation9 + $0xf0] sm:$0xff]   ;;  %v993_v44 = vld [vmem:[#allocation9 + $0x28] sm:$0xff]   ;;  %v123_v4 = vsub.s32 0, %v122_v3  ;;  %v131_v5 = vsub.s32 2, %v122_v3  ;;  %v127_v9 = vsub.s32 1, %v122_v3  ;;  %p1108_p7 = scmp.lt.s32.totalorder %s799_s16, %s799_s16 }
  0x42   :  { %v986_v37 = vld [vmem:[#allocation9 + $0xb8] sm:$0xff]   ;;  %v989_v40 = vld [vmem:[#allocation9 + $0x30] sm:$0xff]   ;;  %v994_v45 = vld [vmem:[#allocation9 + $0xa8] sm:$0xff]   ;;  %v135_v10 = vsub.s32 3, %v122_v3  ;;  %s1103_s17 = scalar_lea.vmem %s799_s16, 256 }
  0x43   :  { %314 = vmatpush1.bf16.msra.mxu0 %v956_v15  ;;  %357 = vmatpush1.bf16.msra.mxu1 %v957_v16  ;;  %v990_v41 = vld [vmem:[#allocation9 + $0xb0] sm:$0xff]   ;;  %v995_v46 = vld [vmem:[#allocation9 + $0x60] sm:$0xff]   ;;  %v999_v50 = vld [vmem:[#allocation9 + $0x58] sm:$0xff]   ;;  %p1104_p6 = scmp.ne.s32.totalorder %s799_s16, %s1103_s17  ;;  %p1109_p8 = scmp.lt.s32.totalorder %s1103_s17, %s1103_s17 }
  0x44   :  { %315 = vmatprep.subr.bf16.mxu0 %v958_v17  ;;  %358 = vmatprep.subr.bf16.mxu1 %v960_v18  ;;  %v996_v47 = vld [vmem:[#allocation9 + $0xe0] sm:$0xff]   ;;  %v1000_v51 = vld [vmem:[#allocation9 + $0xd8] sm:$0xff]   ;;  %v1003_v54 = vld [vmem:[#allocation9 + $0x50] sm:$0xff]  }
  0x45   :  { %v997_v48 = vld [vmem:[#allocation9 + $0x20] sm:$0xff]   ;;  %v1001_v52 = vld [vmem:[#allocation9 + $0x18] sm:$0xff]   ;;  %v1004_v55 = vld [vmem:[#allocation9 + $0xd0] sm:$0xff]   ;;  %p1110_p9 = por %p1109_p8, %p1108_p7 }
  0x46   :  { %v998_v49 = vld [vmem:[#allocation9 + $0xa0] sm:$0xff]   ;;  %v1002_v53 = vld [vmem:[#allocation9 + $0x98] sm:$0xff]   ;;  %v1005_v56 = vld [vmem:[#allocation9 + $0x10] sm:$0xff]  }
  0x47   :  { %316 = vmatpush1.bf16.msra.mxu0 %v962_v19  ;;  %359 = vmatpush1.bf16.msra.mxu1 %v963_v20  ;;  %v1006_v57 = vld [vmem:[#allocation9 + $0x90] sm:$0xff]   ;;  %v1007_v58 = vld [vmem:[#allocation9 + $0x48] sm:$0xff]   ;;  %v1011_v62 = vld [vmem:[#allocation9 + $0x40] sm:$0xff]   ;;  %p1111_p10 = pnand %p1110_p9, %p1104_p6 }
  0x48   :  { %317 = vmatprep.subr.bf16.mxu0 %v964_v21  ;;  %360 = vmatprep.subr.bf16.mxu1 %v966_v22  ;;  %v1008_v59 = vld [vmem:[#allocation9 + $0xc8] sm:$0xff]   ;;  %v1012_v63 = vld [vmem:[#allocation9 + $0xc0] sm:$0xff]   ;;  %v119_v6 = vld [vmem:[#allocation8] sm:$0xf] }
  0x49   :  { %v1009_v60 = vld [vmem:[#allocation9 + $0x8] sm:$0xff]   ;;  %v1013_v0 = vld [vmem:[#allocation9] sm:$0xff]   ;;  %v124_v11 = vrot.slane %v119_v6, %v123_v4  ;;  %v132_v12 = vrot.slane %v119_v6, %v131_v5  ;;  %v128_v15 = vrot.slane %v119_v6, %v127_v9  ;;  %v136_v16 = vrot.slane %v119_v6, %v135_v10 }
  0x4a   :  { %v1010_v61 = vld [vmem:[#allocation9 + $0x88] sm:$0xff]   ;;  %v1014_v1 = vld [vmem:[#allocation9 + $0x80] sm:$0xff]  }
  0x4b   :  { %318 = vmatpush1.bf16.msra.mxu0 %v968_v23  ;;  %361 = vmatpush1.bf16.msra.mxu1 %v969_v24 }
  0x4c   :  { %319 = vmatprep.subr.bf16.mxu0 %v970_v25  ;;  %362 = vmatprep.subr.bf16.mxu1 %v972_v26 }
  0x4f   :  { %320 = vmatpush1.bf16.msra.mxu0 %v974_v27  ;;  %363 = vmatpush1.bf16.msra.mxu1 %v975_v28 }
  0x50   :  { %321 = vmatprep.subr.bf16.mxu0 %v976_v29  ;;  %364 = vmatprep.subr.bf16.mxu1 %v978_v30 }
  0x53   :  { %322 = vmatpush1.bf16.msra.mxu0 %v980_v31  ;;  %365 = vmatpush1.bf16.msra.mxu1 %v981_v32 }
  0x54   :  { %878 = vmatprep.subr.bf16.mxu0 %v983_v34  ;;  %900 = vmatprep.subr.bf16.mxu1 %v984_v35 }
  0x56   :  { %340 = vmatmul.mubr.bf16.vlgmr.msra.gmra.mxu0 %v982_v33  ;;  %383 = vmatmul.mubr.bf16.vlgmr.msra.gmra.mxu1 %v982_v33 }
  0x57   :  { %879 = vmatpush3.bf16.msra.mxu0 %v985_v36  ;;  %901 = vmatpush3.bf16.msra.mxu1 %v986_v37 }
  0x58   :  { %880 = vmatprep.subr.bf16.mxu0 %v987_v38  ;;  %902 = vmatprep.subr.bf16.mxu1 %v988_v39 }
  0x5b   :  { %881 = vmatpush3.bf16.msra.mxu0 %v989_v40  ;;  %903 = vmatpush3.bf16.msra.mxu1 %v990_v41 }
  0x5c   :  { %882 = vmatprep.subr.bf16.mxu0 %v991_v42  ;;  %904 = vmatprep.subr.bf16.mxu1 %v992_v43 }
  0x5f   :  { %883 = vmatpush3.bf16.msra.mxu0 %v993_v44  ;;  %905 = vmatpush3.bf16.msra.mxu1 %v994_v45 }
  0x60   :  { %884 = vmatprep.subr.bf16.mxu0 %v995_v46  ;;  %906 = vmatprep.subr.bf16.mxu1 %v996_v47 }
  0x63   :  { %885 = vmatpush3.bf16.msra.mxu0 %v997_v48  ;;  %907 = vmatpush3.bf16.msra.mxu1 %v998_v49 }
  0x64   :  { %886 = vmatprep.subr.bf16.mxu0 %v999_v50  ;;  %908 = vmatprep.subr.bf16.mxu1 %v1000_v51 }
  0x67   :  { %887 = vmatpush3.bf16.msra.mxu0 %v1001_v52  ;;  %909 = vmatpush3.bf16.msra.mxu1 %v1002_v53 }
  0x68   :  { %888 = vmatprep.subr.bf16.mxu0 %v1003_v54  ;;  %910 = vmatprep.subr.bf16.mxu1 %v1004_v55 }
  0x6b   :  { %889 = vmatpush3.bf16.msra.mxu0 %v1005_v56  ;;  %911 = vmatpush3.bf16.msra.mxu1 %v1006_v57 }
  0x6c   :  { %890 = vmatprep.subr.bf16.mxu0 %v1007_v58  ;;  %912 = vmatprep.subr.bf16.mxu1 %v1008_v59 }
  0x6f   :  { %891 = vmatpush3.bf16.msra.mxu0 %v1009_v60  ;;  %913 = vmatpush3.bf16.msra.mxu1 %v1010_v61 }
  0x70   :  { %892 = vmatprep.subr.bf16.mxu0 %v1011_v62  ;;  %914 = vmatprep.subr.bf16.mxu1 %v1012_v63 }
  0x73   :  { %893 = vmatpush3.bf16.msra.mxu0 %v1013_v0  ;;  %915 = vmatpush3.bf16.msra.mxu1 %v1014_v1 }
 0x116   :  { %v341_v7 = vpop.f32.mrf.mxu0  ;;  %v384_v8 = vpop.f32.mrf.mxu1 }
 0x117   :  { %v342_v19 = vadd.f32 %v341_v7, %v124_v11  ;;  %v385_v20 = vadd.f32 %v384_v8, %v132_v12 }
 0x118   :  { %v343_v13 = vpop.f32.mrf.mxu0  ;;  %v386_v14 = vpop.f32.mrf.mxu1 }
 0x119   :  { %v344_v29 = vadd.f32 %v343_v13, %v128_v15  ;;  %v387_v30 = vadd.f32 %v386_v14, %v136_v16 }
 0x11a   :  { %v345_v17 = vpop.f32.mrf.mxu0  ;;  %v388_v18 = vpop.f32.mrf.mxu1 }
 0x11b   :  { %v346_v21 = vadd.f32 %v345_v17, %v124_v11  ;;  %v389_v22 = vadd.f32 %v388_v18, %v132_v12  ;;  %v877_v12 = vld [vmem:[%s1195_s4] ss:$0 sm:$0xff] }
 0x11c   :  { %v347_v23 = vpop.f32.mrf.mxu0  ;;  %v390_v24 = vpop.f32.mrf.mxu1 }
 0x11d   :  { %v393_v25 = vpack.c.bf16 %v346_v21, %v342_v19  ;;  %v395_v26 = vpack.c.bf16 %v389_v22, %v385_v20  ;;  %v348_v27 = vadd.f32 %v347_v23, %v128_v15  ;;  %v391_v28 = vadd.f32 %v390_v24, %v136_v16 }
 0x11f   :  { %v397_v31 = vmul.bf16 %v393_v25, %v393_v25  ;;  %v399_v32 = vmul.bf16 %v395_v26, %v395_v26  ;;  %v394_v33 = vpack.c.bf16 %v348_v27, %v344_v29  ;;  %v396_v34 = vpack.c.bf16 %v391_v28, %v387_v30 }
 0x120   :  { %v405_v37 = vmul.bf16 1061961548, %v393_v25  ;;  %v407_v41 = vmul.bf16 1061961548, %v395_v26  ;;  %v401_v61 = vmul.bf16 1056980736, %v393_v25 }
 0x121   :  { %v409_v35 = vmul.bf16 1027030327, %v397_v31  ;;  %v411_v36 = vmul.bf16 1027030327, %v399_v32  ;;  %v398_v38 = vmul.bf16 %v394_v33, %v394_v33  ;;  %v400_v39 = vmul.bf16 %v396_v34, %v396_v34 }
 0x122   :  { %v406_v47 = vmul.bf16 1061961548, %v394_v33  ;;  %v408_v49 = vmul.bf16 1061961548, %v396_v34  ;;  %v402_v58 = vmul.bf16 1056980736, %v394_v33 }
 0x123   :  { %v413_v40 = vadd.bf16 1065369472, %v409_v35  ;;  %v415_v42 = vadd.bf16 1065369472, %v411_v36  ;;  %v410_v43 = vmul.bf16 1027030327, %v398_v38 }
 0x124   :  { %v412_v44 = vmul.bf16 1027030327, %v400_v39  ;;  %v404_v62 = vmul.bf16 1056980736, %v396_v34  ;;  %v403_v0 = vmul.bf16 1056980736, %v395_v26 }
 0x125   :  { %v417_v45 = vmul.bf16 %v413_v40, %v405_v37  ;;  %v419_v46 = vmul.bf16 %v415_v42, %v407_v41  ;;  %v414_v48 = vadd.bf16 1065369472, %v410_v43 }
 0x126   :  { %v416_v50 = vadd.bf16 1065369472, %v412_v44 }
 0x127   :  { %1015 = vtanh.bf16 %v417_v45  ;;  %v418_v51 = vmul.bf16 %v414_v48, %v406_v47 }
 0x128   :  { %1017 = vtanh.bf16 %v419_v46  ;;  %v420_v52 = vmul.bf16 %v416_v50, %v408_v49 }
 0x129   :  { %1019 = vtanh.bf16 %v418_v51 }
 0x12a   :  { %1021 = vtanh.bf16 %v420_v52 }
 0x135   :  { %v1016_v53 = vpop.eup %1015 }
 0x136   :  { %v1018_v54 = vpop.eup %1017  ;;  %v425_v56 = vadd.bf16 1065369472, %v1016_v53 }
 0x137   :  { %v1020_v55 = vpop.eup %1019  ;;  %v427_v60 = vadd.bf16 1065369472, %v1018_v54 }
 0x138   :  { %v1022_v57 = vpop.eup %1021  ;;  %v426_v59 = vadd.bf16 1065369472, %v1020_v55  ;;  %v429_v3 = vmul.bf16 %v425_v56, %v401_v61 }
 0x139   :  { %v428_v63 = vadd.bf16 1065369472, %v1022_v57  ;;  %v431_v4 = vmul.bf16 %v427_v60, %v403_v0 }
 0x13a   :  { %v430_v1 = vmul.bf16 %v426_v59, %v402_v58 }
 0x13b   :  { %v432_v2 = vmul.bf16 %v428_v63, %v404_v62 }
 0x13c   :  { %723 = vmatprep.mubr.bf16.mxu0 %v430_v1 }
 0x13d   :  { %764 = vmatprep.mubr.bf16.mxu1 %v432_v2  ;;  %724 = vmatmul.mubr.bf16.vlgmr.msra.gmra.mxu0 %v429_v3 }
 0x13e   :  { %765 = vmatmul.mubr.bf16.vlgmr.msra.gmra.mxu1 %v431_v4 }
 0x1fd   :  { %v894_v5 = vpop.f32.mrf.mxu0 }
 0x1fe   :  { %v916_v6 = vpop.f32.mrf.mxu1 }
 0x1ff   :  { %v895_v7 = vpop.f32.mrf.mxu0 }
 0x200   :  { %v896_v8 = vadd.f32 %v895_v7, %v894_v5  ;;  %v917_v9 = vpop.f32.mrf.mxu1 }
 0x201   :  { %v918_v10 = vadd.f32 %v917_v9, %v916_v6  ;;  %v897_v11 = vpop.f32.mrf.mxu0 }
 0x202   :  { %v919_v13 = vpop.f32.mrf.mxu1 }
 0x203   :  { %v767_v14 = vadd.f32 %v918_v10, %v896_v8  ;;  %v898_v15 = vpop.f32.mrf.mxu0 }
 0x204   :  { %v899_v16 = vadd.f32 %v898_v15, %v897_v11  ;;  %v920_v17 = vpop.f32.mrf.mxu1 }
 0x205   :  { %v789_v18 = vadd.f32 %v877_v12, %v767_v14  ;;  %v921_v19 = vadd.f32 %v920_v17, %v919_v13 }
 0x207   :  { %791 = vst [vmem:[#allocation11] sm:$0xff] %v789_v18  ;;  %v770_v20 = vadd.f32 %v921_v19, %v899_v16 }
 0x209   :  { %v790_v21 = vadd.f32 %v877_v12, %v770_v20 }
 0x20b   :  { %792 = vst [vmem:[#allocation11 + $0x8] sm:$0xff] %v790_v21 }
 0x20c   :  { %1114 = shalt.err (!%p1111_p10)
}
 0x20d   :  { %s1141_s4 = smov 128   ;;  %s1142_s18 = smov 8  }
 0x20e   :  { %804 = dma.vmem_to_hbm [thread:$0]  %s799_s16, 256, %s1196_s5, [#allocation5], %s1141_s4, %s1141_s4, %s1142_s18  }
 0x20f   :  { %1129 = dma.done.wait [#allocation5], 256  }
 0x210   :  { %1130 = vsyncadd [#allocation5], 4294967040 }
 0x211   :  { %808 = vsyncpa [#allocation4], 1 }
 0x212   :  { %809 = vsyncpa [#allocation7], 1 }
 0x213   :  { %810 = vsyncpa [#allocation10], 1 }
 0x214   :  { %811 = vsyncpa [#allocation5], 1 }

</bundles_post_ra>
